<compile_context>
chip_gen: v6e
topology: v6e:2x2x1
jax: 0.10.0
libtpu: 0.0.40
codegen_flags: <defaults>
</compile_context>

<pallas_src>
import math
import functools

import jax
import jax.numpy as jnp
import numpy as np
from jax.experimental import pallas as pl
from jax.experimental.pallas import tpu as pltpu

HUGE_INT = 1e31
LEAKY_SLOPE = 0.01  # nn.LeakyReLU default negative_slope


def _mha_kernel(q_ref, k_ref, v_ref, m_ref,
                wq_ref, wk_ref, wv_ref, b_ref,
                o_ref, *, batch, len_q, len_k, num_heads, head_dim):
    B, Lq, Lk, H, D = batch, len_q, len_k, num_heads, head_dim

    bias = b_ref[...]  # (3, H*D): rows = [bq * 1/sqrt(D), bk, bv]

    # ---- whole-batch fused-head projections (wide MXU matmuls) -------------
    # 1/sqrt(D) is pre-folded into wq_f / bias[0] wrapper-side.
    qp = jnp.dot(q_ref[...], wq_ref[...],
                 preferred_element_type=jnp.float32) + bias[0:1, :]   # (B*Lq, H*D)
    kp = jnp.dot(k_ref[...], wk_ref[...],
                 preferred_element_type=jnp.float32) + bias[1:2, :]   # (B*Lk, H*D)
    vp = jnp.dot(v_ref[...], wv_ref[...],
                 preferred_element_type=jnp.float32) + bias[2:3, :]   # (B*Lk, H*D)
    vp = jnp.where(vp > 0, vp, LEAKY_SLOPE * vp)                      # LeakyReLU

    # ---- relayout to head-batched (H*B, L, D) ------------------------------
    # Lane slices + stack along a new leading axis + leading-dim reshape only
    # (no 4-D transposes), so the relayout stays tile-friendly.
    def split_heads(x2d, L):
        parts = [x2d[:, h * D:(h + 1) * D] for h in range(H)]    # H x (B*L, D)
        return jnp.stack(parts, axis=0).reshape(H * B, L, D)     # (H*B, L, D)

    qh = split_heads(qp, Lq)
    kh = split_heads(kp, Lk)
    vh = split_heads(vp, Lk)

    # ---- one batched QK^T over all (head, batch) pairs ----------------------
    scores = jnp.einsum('bqd,bkd->bqk', qh, kh,
                        preferred_element_type=jnp.float32)      # (H*B, Lq, Lk)

    # Additive mask bias, computed once and broadcast over heads / queries.
    mask_bias = (-HUGE_INT) * (1.0 - m_ref[...])                 # (B, Lk)
    scores = (scores.reshape(H, B, Lq, Lk)
              + mask_bias[None, :, None, :]).reshape(H * B, Lq, Lk)

    # ---- one softmax over the whole stacked score tensor --------------------
    s_max = jnp.max(scores, axis=-1, keepdims=True)
    e = jnp.exp(scores - s_max)
    attn = e * pl.reciprocal(jnp.sum(e, axis=-1, keepdims=True), approx=True)

    # ---- one batched PV matmul ----------------------------------------------
    out = jnp.einsum('bqk,bkd->bqd', attn, vh,
                     preferred_element_type=jnp.float32)         # (H*B, Lq, D)

    # ---- assemble torch.cat(heads, dim=2) layout, single store --------------
    out = out.reshape(H, B, Lq, D)
    o_ref[...] = jnp.concatenate([out[h] for h in range(H)], axis=-1)  # (B, Lq, H*D)


def pack_params(params, head_dim):
    """One-time (out of the hot path) packing of the per-head Linear weights.

    Head h occupies output columns [h*D, (h+1)*D).  The 1/sqrt(D) attention
    scale is folded into the query weights/bias so the kernel never applies it.
    """
    wq, bq, wk, bk, wv, bv = params
    H, E, D = wq.shape
    assert D == head_dim and H * D == E
    inv_sqrt_d = 1.0 / math.sqrt(D)
    wq_f = jnp.transpose(wq, (1, 0, 2)).reshape(E, H * D) * inv_sqrt_d
    wk_f = jnp.transpose(wk, (1, 0, 2)).reshape(E, H * D)
    wv_f = jnp.transpose(wv, (1, 0, 2)).reshape(3 * E, H * D)
    bias_f = jnp.stack([bq.reshape(H * D) * inv_sqrt_d,
                        bk.reshape(H * D),
                        bv.reshape(H * D)], axis=0)
    return (wq_f, wk_f, wv_f, bias_f, H, D)


def multihead_attention(query, key, value, masks, packed):
    """Pallas implementation of MultiheadAttention.forward."""
    wq_f, wk_f, wv_f, bias_f, H, D = packed
    B, Lq, E = query.shape
    _, Lk, _ = key.shape
    assert H * D == E

    # Merge the batch into the matmul row dimension (free, contiguous reshapes).
    q2 = query.reshape(B * Lq, E)
    k2 = key.reshape(B * Lk, E)
    v2 = value.reshape(B * Lk, 3 * E)
    m2 = masks.astype(jnp.float32)

    kernel = functools.partial(_mha_kernel, batch=B, len_q=Lq, len_k=Lk,
                               num_heads=H, head_dim=D)

    out = pl.pallas_call(
        kernel,
        out_shape=jax.ShapeDtypeStruct((B, Lq, H * D), jnp.float32),
        grid_spec=pltpu.PrefetchScalarGridSpec(
            num_scalar_prefetch=0,
            grid=(1,),  # single step: whole problem (~40 KB) resident in VMEM
            in_specs=[
                pl.BlockSpec((B * Lq, E), lambda i: (0, 0)),        # query rows
                pl.BlockSpec((B * Lk, E), lambda i: (0, 0)),        # key rows
                pl.BlockSpec((B * Lk, 3 * E), lambda i: (0, 0)),    # value rows
                pl.BlockSpec((B, Lk), lambda i: (0, 0)),            # masks
                pl.BlockSpec((E, H * D), lambda i: (0, 0)),         # Wq fused (scale folded)
                pl.BlockSpec((E, H * D), lambda i: (0, 0)),         # Wk fused
                pl.BlockSpec((3 * E, H * D), lambda i: (0, 0)),     # Wv fused
                pl.BlockSpec((3, H * D), lambda i: (0, 0)),         # biases
            ],
            out_specs=pl.BlockSpec((B, Lq, H * D), lambda i: (0, 0, 0)),
        ),
        compiler_params=pltpu.CompilerParams(
            dimension_semantics=("arbitrary",)),
    )(q2, k2, v2, m2, wq_f, wk_f, wv_f, bias_f)

    # Already in torch.cat(attn_output, dim=2) layout.
    return out


def reference_mha(query, key, value, masks, params):
    """Pure-JAX reference mirroring the PyTorch forward exactly."""
    wq, bq, wk, bk, wv, bv = params
    H, _, D = wq.shape
    outs = []
    for h in range(H):
        qp = query @ wq[h] + bq[h]
        kp = key @ wk[h] + bk[h]
        vp = value @ wv[h] + bv[h]
        vp = jnp.where(vp > 0, vp, LEAKY_SLOPE * vp)
        scores = jnp.einsum("bqd,bkd->bqk", qp, kp) / math.sqrt(D)
        scores = scores - HUGE_INT * (1.0 - masks[:, None, :])
        attn = jax.nn.softmax(scores, axis=2)
        outs.append(jnp.einsum("bqk,bkd->bqd", attn, vp))
    return jnp.concatenate(outs, axis=2)


def init_params(key, embed_dim, head_dim, num_heads):
    """Deterministic synthetic init of the per-head Linear weights/biases."""
    ks = jax.random.split(key, 6)
    scale_e = 1.0 / math.sqrt(embed_dim)
    scale_v = 1.0 / math.sqrt(3 * embed_dim)
    wq = jax.random.uniform(ks[0], (num_heads, embed_dim, head_dim),
                            jnp.float32, -scale_e, scale_e)
    bq = jax.random.uniform(ks[1], (num_heads, head_dim),
                            jnp.float32, -scale_e, scale_e)
    wk = jax.random.uniform(ks[2], (num_heads, embed_dim, head_dim),
                            jnp.float32, -scale_e, scale_e)
    bk = jax.random.uniform(ks[3], (num_heads, head_dim),
                            jnp.float32, -scale_e, scale_e)
    wv = jax.random.uniform(ks[4], (num_heads, 3 * embed_dim, head_dim),
                            jnp.float32, -scale_v, scale_v)
    bv = jax.random.uniform(ks[5], (num_heads, head_dim),
                            jnp.float32, -scale_v, scale_v)
    return (wq, bq, wk, bk, wv, bv)


if __name__ == "__main__":
    B, Lq, Lk = 2, 8, 8
    embed_dim, head_dim, num_heads = 32, 8, 4   # head_dim * num_heads == embed_dim

    root = jax.random.PRNGKey(0)
    kq, kk, kv, km, kp = jax.random.split(root, 5)

    query = jax.random.normal(kq, (B, Lq, embed_dim), jnp.float32)
    key_in = jax.random.normal(kk, (B, Lk, embed_dim), jnp.float32)
    value = jax.random.normal(kv, (B, Lk, 3 * embed_dim), jnp.float32)
    # Binary mask, guaranteed at least one valid key per batch row.
    masks = (jax.random.uniform(km, (B, Lk)) > 0.3).astype(jnp.float32)
    masks = masks.at[:, 0].set(1.0)

    params = init_params(kp, embed_dim, head_dim, num_heads)
    packed = pack_params(params, head_dim)   # hoisted out of the per-call path

    out = multihead_attention(query, key_in, value, masks, packed)
    out = jax.block_until_ready(out)

    ref = reference_mha(query, key_in, value, masks, params)
    # 2e-3 tolerance accommodates the approx (EUP) reciprocal in the softmax;
    # approx=False in the kernel restores <=1e-4 parity.
    np.testing.assert_allclose(np.asarray(out), np.asarray(ref),
                               rtol=2e-3, atol=2e-3)

    assert out.shape == (B, Lq, embed_dim)
    print("KERNEL_OK")
</pallas_src>

<mosaic_0001>
module attributes {stable_mosaic.version = 11 : i64} {
  func.func @_mha_kernel(%arg0: i32, %arg1: memref<16x32xf32, #tpu.memory_space<vmem>>, %arg2: memref<16x32xf32, #tpu.memory_space<vmem>>, %arg3: memref<16x96xf32, #tpu.memory_space<vmem>>, %arg4: memref<2x8xf32, #tpu.memory_space<vmem>>, %arg5: memref<32x32xf32, #tpu.memory_space<vmem>>, %arg6: memref<32x32xf32, #tpu.memory_space<vmem>>, %arg7: memref<96x32xf32, #tpu.memory_space<vmem>>, %arg8: memref<3x32xf32, #tpu.memory_space<vmem>>, %arg9: memref<2x8x32xf32, #tpu.memory_space<vmem>>) attributes {dimension_semantics = [#tpu.dimension_semantics<arbitrary>], iteration_bounds = array<i64: 1>, scalar_prefetch = 0 : i64, scratch_operands = 0 : i64, tpu.core_type = #tpu.core_type<tc>, window_params = [{pipeline_mode = #tpu.pipeline_mode<synchronous>, transform_indices = @transform_0, window_bounds = array<i64: 16, 32>}, {pipeline_mode = #tpu.pipeline_mode<synchronous>, transform_indices = @transform_1, window_bounds = array<i64: 16, 32>}, {pipeline_mode = #tpu.pipeline_mode<synchronous>, transform_indices = @transform_2, window_bounds = array<i64: 16, 96>}, {pipeline_mode = #tpu.pipeline_mode<synchronous>, transform_indices = @transform_3, window_bounds = array<i64: 2, 8>}, {pipeline_mode = #tpu.pipeline_mode<synchronous>, transform_indices = @transform_4, window_bounds = array<i64: 32, 32>}, {pipeline_mode = #tpu.pipeline_mode<synchronous>, transform_indices = @transform_5, window_bounds = array<i64: 32, 32>}, {pipeline_mode = #tpu.pipeline_mode<synchronous>, transform_indices = @transform_6, window_bounds = array<i64: 96, 32>}, {pipeline_mode = #tpu.pipeline_mode<synchronous>, transform_indices = @transform_7, window_bounds = array<i64: 3, 32>}, {pipeline_mode = #tpu.pipeline_mode<synchronous>, transform_indices = @transform_8, window_bounds = array<i64: 2, 8, 32>}]} {
    %c0 = arith.constant 0 : index
    %c0_0 = arith.constant 0 : index
    %0 = vector.load %arg8[%c0, %c0_0] : memref<3x32xf32, #tpu.memory_space<vmem>>, vector<3x32xf32>
    %c0_1 = arith.constant 0 : index
    %c0_2 = arith.constant 0 : index
    %1 = vector.load %arg1[%c0_1, %c0_2] : memref<16x32xf32, #tpu.memory_space<vmem>>, vector<16x32xf32>
    %c0_3 = arith.constant 0 : index
    %c0_4 = arith.constant 0 : index
    %2 = vector.load %arg5[%c0_3, %c0_4] : memref<32x32xf32, #tpu.memory_space<vmem>>, vector<32x32xf32>
    %cst = arith.constant dense<0.000000e+00> : vector<16x32xf32>
    %3 = tpu.matmul %1, %2, %cst {dimension_numbers = #tpu.dot_dimension_numbers<[1], [0], [0], [1], [0, 0, 1, 1], [], []>} : vector<16x32xf32>, vector<32x32xf32>, vector<16x32xf32> -> vector<16x32xf32>
    %4 = vector.extract_strided_slice %0 {offsets = [0, 0], sizes = [1, 32], strides = [1, 1]} : vector<3x32xf32> to vector<1x32xf32>
    %5 = vector.broadcast %4 : vector<1x32xf32> to vector<16x32xf32>
    %6 = arith.addf %3, %5 : vector<16x32xf32>
    %c0_5 = arith.constant 0 : index
    %c0_6 = arith.constant 0 : index
    %7 = vector.load %arg2[%c0_5, %c0_6] : memref<16x32xf32, #tpu.memory_space<vmem>>, vector<16x32xf32>
    %c0_7 = arith.constant 0 : index
    %c0_8 = arith.constant 0 : index
    %8 = vector.load %arg6[%c0_7, %c0_8] : memref<32x32xf32, #tpu.memory_space<vmem>>, vector<32x32xf32>
    %cst_9 = arith.constant dense<0.000000e+00> : vector<16x32xf32>
    %9 = tpu.matmul %7, %8, %cst_9 {dimension_numbers = #tpu.dot_dimension_numbers<[1], [0], [0], [1], [0, 0, 1, 1], [], []>} : vector<16x32xf32>, vector<32x32xf32>, vector<16x32xf32> -> vector<16x32xf32>
    %10 = vector.extract_strided_slice %0 {offsets = [1, 0], sizes = [1, 32], strides = [1, 1]} : vector<3x32xf32> to vector<1x32xf32>
    %11 = vector.broadcast %10 : vector<1x32xf32> to vector<16x32xf32>
    %12 = arith.addf %9, %11 : vector<16x32xf32>
    %c0_10 = arith.constant 0 : index
    %c0_11 = arith.constant 0 : index
    %13 = vector.load %arg3[%c0_10, %c0_11] : memref<16x96xf32, #tpu.memory_space<vmem>>, vector<16x96xf32>
    %c0_12 = arith.constant 0 : index
    %c0_13 = arith.constant 0 : index
    %14 = vector.load %arg7[%c0_12, %c0_13] : memref<96x32xf32, #tpu.memory_space<vmem>>, vector<96x32xf32>
    %cst_14 = arith.constant dense<0.000000e+00> : vector<16x32xf32>
    %15 = tpu.matmul %13, %14, %cst_14 {dimension_numbers = #tpu.dot_dimension_numbers<[1], [0], [0], [1], [0, 0, 1, 1], [], []>} : vector<16x96xf32>, vector<96x32xf32>, vector<16x32xf32> -> vector<16x32xf32>
    %16 = vector.extract_strided_slice %0 {offsets = [2, 0], sizes = [1, 32], strides = [1, 1]} : vector<3x32xf32> to vector<1x32xf32>
    %17 = vector.broadcast %16 : vector<1x32xf32> to vector<16x32xf32>
    %18 = arith.addf %15, %17 : vector<16x32xf32>
    %cst_15 = arith.constant 0.000000e+00 : f32
    %19 = vector.broadcast %cst_15 : f32 to vector<16x32xf32>
    %20 = arith.cmpf ogt, %18, %19 : vector<16x32xf32>
    %cst_16 = arith.constant 0.00999999977 : f32
    %21 = vector.broadcast %cst_16 : f32 to vector<16x32xf32>
    %22 = arith.mulf %21, %18 : vector<16x32xf32>
    %23 = arith.select %20, %18, %22 : vector<16x32xi1>, vector<16x32xf32>
    %24 = vector.extract_strided_slice %6 {offsets = [0, 0], sizes = [16, 8], strides = [1, 1]} : vector<16x32xf32> to vector<16x8xf32>
    %25 = vector.extract_strided_slice %6 {offsets = [0, 8], sizes = [16, 8], strides = [1, 1]} : vector<16x32xf32> to vector<16x8xf32>
    %26 = vector.extract_strided_slice %6 {offsets = [0, 16], sizes = [16, 8], strides = [1, 1]} : vector<16x32xf32> to vector<16x8xf32>
    %27 = vector.extract_strided_slice %6 {offsets = [0, 24], sizes = [16, 8], strides = [1, 1]} : vector<16x32xf32> to vector<16x8xf32>
    %28 = vector.shape_cast %24 : vector<16x8xf32> to vector<1x16x8xf32>
    %29 = vector.shape_cast %25 : vector<16x8xf32> to vector<1x16x8xf32>
    %30 = vector.shape_cast %26 : vector<16x8xf32> to vector<1x16x8xf32>
    %31 = vector.shape_cast %27 : vector<16x8xf32> to vector<1x16x8xf32>
    %32 = tpu.concatenate %28, %29, %30, %31 in 0 : vector<1x16x8xf32>, vector<1x16x8xf32>, vector<1x16x8xf32>, vector<1x16x8xf32> -> vector<4x16x8xf32>
    %33 = vector.shape_cast %32 : vector<4x16x8xf32> to vector<8x8x8xf32>
    %34 = vector.extract_strided_slice %12 {offsets = [0, 0], sizes = [16, 8], strides = [1, 1]} : vector<16x32xf32> to vector<16x8xf32>
    %35 = vector.extract_strided_slice %12 {offsets = [0, 8], sizes = [16, 8], strides = [1, 1]} : vector<16x32xf32> to vector<16x8xf32>
    %36 = vector.extract_strided_slice %12 {offsets = [0, 16], sizes = [16, 8], strides = [1, 1]} : vector<16x32xf32> to vector<16x8xf32>
    %37 = vector.extract_strided_slice %12 {offsets = [0, 24], sizes = [16, 8], strides = [1, 1]} : vector<16x32xf32> to vector<16x8xf32>
    %38 = vector.shape_cast %34 : vector<16x8xf32> to vector<1x16x8xf32>
    %39 = vector.shape_cast %35 : vector<16x8xf32> to vector<1x16x8xf32>
    %40 = vector.shape_cast %36 : vector<16x8xf32> to vector<1x16x8xf32>
    %41 = vector.shape_cast %37 : vector<16x8xf32> to vector<1x16x8xf32>
    %42 = tpu.concatenate %38, %39, %40, %41 in 0 : vector<1x16x8xf32>, vector<1x16x8xf32>, vector<1x16x8xf32>, vector<1x16x8xf32> -> vector<4x16x8xf32>
    %43 = vector.shape_cast %42 : vector<4x16x8xf32> to vector<8x8x8xf32>
    %44 = vector.extract_strided_slice %23 {offsets = [0, 0], sizes = [16, 8], strides = [1, 1]} : vector<16x32xf32> to vector<16x8xf32>
    %45 = vector.extract_strided_slice %23 {offsets = [0, 8], sizes = [16, 8], strides = [1, 1]} : vector<16x32xf32> to vector<16x8xf32>
    %46 = vector.extract_strided_slice %23 {offsets = [0, 16], sizes = [16, 8], strides = [1, 1]} : vector<16x32xf32> to vector<16x8xf32>
    %47 = vector.extract_strided_slice %23 {offsets = [0, 24], sizes = [16, 8], strides = [1, 1]} : vector<16x32xf32> to vector<16x8xf32>
    %48 = vector.shape_cast %44 : vector<16x8xf32> to vector<1x16x8xf32>
    %49 = vector.shape_cast %45 : vector<16x8xf32> to vector<1x16x8xf32>
    %50 = vector.shape_cast %46 : vector<16x8xf32> to vector<1x16x8xf32>
    %51 = vector.shape_cast %47 : vector<16x8xf32> to vector<1x16x8xf32>
    %52 = tpu.concatenate %48, %49, %50, %51 in 0 : vector<1x16x8xf32>, vector<1x16x8xf32>, vector<1x16x8xf32>, vector<1x16x8xf32> -> vector<4x16x8xf32>
    %53 = vector.shape_cast %52 : vector<4x16x8xf32> to vector<8x8x8xf32>
    "tpu.trace_start"() <{level = 10 : i32, message = "bqd,bkd->bqk"}> : () -> ()
    %cst_17 = arith.constant dense<0.000000e+00> : vector<8x8x8xf32>
    %54 = tpu.matmul %33, %43, %cst_17 {dimension_numbers = #tpu.dot_dimension_numbers<[2], [2], [1], [1], [0, 0, 0, 1, 1, 1], [0], [0]>} : vector<8x8x8xf32>, vector<8x8x8xf32>, vector<8x8x8xf32> -> vector<8x8x8xf32>
    "tpu.trace_stop"() : () -> ()
    %c0_18 = arith.constant 0 : index
    %c0_19 = arith.constant 0 : index
    %55 = vector.load %arg4[%c0_18, %c0_19] : memref<2x8xf32, #tpu.memory_space<vmem>>, vector<2x8xf32>
    %cst_20 = arith.constant 1.000000e+00 : f32
    %56 = vector.broadcast %cst_20 : f32 to vector<2x8xf32>
    %57 = arith.subf %56, %55 : vector<2x8xf32>
    %cst_21 = arith.constant -1.000000e+31 : f32
    %58 = vector.broadcast %cst_21 : f32 to vector<2x8xf32>
    %59 = arith.mulf %58, %57 : vector<2x8xf32>
    %60 = vector.shape_cast %54 : vector<8x8x8xf32> to vector<4x2x8x8xf32>
    %61 = vector.shape_cast %59 : vector<2x8xf32> to vector<1x2x1x8xf32>
    %62 = vector.broadcast %61 : vector<1x2x1x8xf32> to vector<4x2x8x8xf32>
    %63 = arith.addf %60, %62 : vector<4x2x8x8xf32>
    %64 = vector.shape_cast %63 : vector<4x2x8x8xf32> to vector<8x8x8xf32>
    %cst_22 = arith.constant dense<0xFF800000> : vector<8x8xf32>
    %65 = vector.multi_reduction <maximumf>, %64, %cst_22 [2] : vector<8x8x8xf32> to vector<8x8xf32>
    %66 = vector.shape_cast %65 : vector<8x8xf32> to vector<8x8x1xf32>
    %67 = vector.broadcast %66 : vector<8x8x1xf32> to vector<8x8x8xf32>
    %68 = arith.subf %64, %67 : vector<8x8x8xf32>
    %69 = math.exp %68 : vector<8x8x8xf32>
    %cst_23 = arith.constant dense<0.000000e+00> : vector<8x8xf32>
    %70 = vector.multi_reduction <add>, %69, %cst_23 [2] : vector<8x8x8xf32> to vector<8x8xf32>
    %71 = vector.shape_cast %70 : vector<8x8xf32> to vector<8x8x1xf32>
    %72 = tpu.reciprocal %71 {approx = true} : vector<8x8x1xf32> -> vector<8x8x1xf32>
    %73 = vector.broadcast %72 : vector<8x8x1xf32> to vector<8x8x8xf32>
    %74 = arith.mulf %69, %73 : vector<8x8x8xf32>
    "tpu.trace_start"() <{level = 10 : i32, message = "bqk,bkd->bqd"}> : () -> ()
    %cst_24 = arith.constant dense<0.000000e+00> : vector<8x8x8xf32>
    %75 = tpu.matmul %74, %53, %cst_24 {dimension_numbers = #tpu.dot_dimension_numbers<[2], [1], [1], [2], [0, 0, 0, 1, 1, 2], [0], [0]>} : vector<8x8x8xf32>, vector<8x8x8xf32>, vector<8x8x8xf32> -> vector<8x8x8xf32>
    "tpu.trace_stop"() : () -> ()
    %76 = vector.shape_cast %75 : vector<8x8x8xf32> to vector<4x2x8x8xf32>
    %77 = vector.extract_strided_slice %76 {offsets = [0, 0, 0, 0], sizes = [1, 2, 8, 8], strides = [1, 1, 1, 1]} : vector<4x2x8x8xf32> to vector<1x2x8x8xf32>
    %78 = vector.shape_cast %77 : vector<1x2x8x8xf32> to vector<2x8x8xf32>
    %79 = vector.extract_strided_slice %76 {offsets = [1, 0, 0, 0], sizes = [1, 2, 8, 8], strides = [1, 1, 1, 1]} : vector<4x2x8x8xf32> to vector<1x2x8x8xf32>
    %80 = vector.shape_cast %79 : vector<1x2x8x8xf32> to vector<2x8x8xf32>
    %81 = vector.extract_strided_slice %76 {offsets = [2, 0, 0, 0], sizes = [1, 2, 8, 8], strides = [1, 1, 1, 1]} : vector<4x2x8x8xf32> to vector<1x2x8x8xf32>
    %82 = vector.shape_cast %81 : vector<1x2x8x8xf32> to vector<2x8x8xf32>
    %83 = vector.extract_strided_slice %76 {offsets = [3, 0, 0, 0], sizes = [1, 2, 8, 8], strides = [1, 1, 1, 1]} : vector<4x2x8x8xf32> to vector<1x2x8x8xf32>
    %84 = vector.shape_cast %83 : vector<1x2x8x8xf32> to vector<2x8x8xf32>
    %85 = tpu.concatenate %78, %80, %82, %84 in 2 : vector<2x8x8xf32>, vector<2x8x8xf32>, vector<2x8x8xf32>, vector<2x8x8xf32> -> vector<2x8x32xf32>
    %c0_25 = arith.constant 0 : index
    %c0_26 = arith.constant 0 : index
    %c0_27 = arith.constant 0 : index
    %86 = vector.load %arg9[%c0_25, %c0_26, %c0_27] : memref<2x8x32xf32, #tpu.memory_space<vmem>>, vector<2x8x32xf32>
    tpu.vector_store %arg9[%c0_25, %c0_26, %c0_27], %85 {strides = array<i32>} : memref<2x8x32xf32, #tpu.memory_space<vmem>>, vector<2x8x32xf32>,
    return
  }
  func.func @transform_0(%arg0: i32) -> (i32, i32) {
    %c0_i32 = arith.constant 0 : i32
    %c0_i32_0 = arith.constant 0 : i32
    %c0_i32_1 = arith.constant 0 : i32
    return %c0_i32, %c0_i32_0 : i32, i32
  }
  func.func @transform_1(%arg0: i32) -> (i32, i32) {
    %c0_i32 = arith.constant 0 : i32
    %c0_i32_0 = arith.constant 0 : i32
    %c0_i32_1 = arith.constant 0 : i32
    return %c0_i32, %c0_i32_0 : i32, i32
  }
  func.func @transform_2(%arg0: i32) -> (i32, i32) {
    %c0_i32 = arith.constant 0 : i32
    %c0_i32_0 = arith.constant 0 : i32
    %c0_i32_1 = arith.constant 0 : i32
    return %c0_i32, %c0_i32_0 : i32, i32
  }
  func.func @transform_3(%arg0: i32) -> (i32, i32) {
    %c0_i32 = arith.constant 0 : i32
    %c0_i32_0 = arith.constant 0 : i32
    %c0_i32_1 = arith.constant 0 : i32
    return %c0_i32, %c0_i32_0 : i32, i32
  }
  func.func @transform_4(%arg0: i32) -> (i32, i32) {
    %c0_i32 = arith.constant 0 : i32
    %c0_i32_0 = arith.constant 0 : i32
    %c0_i32_1 = arith.constant 0 : i32
    return %c0_i32, %c0_i32_0 : i32, i32
  }
  func.func @transform_5(%arg0: i32) -> (i32, i32) {
    %c0_i32 = arith.constant 0 : i32
    %c0_i32_0 = arith.constant 0 : i32
    %c0_i32_1 = arith.constant 0 : i32
    return %c0_i32, %c0_i32_0 : i32, i32
  }
  func.func @transform_6(%arg0: i32) -> (i32, i32) {
    %c0_i32 = arith.constant 0 : i32
    %c0_i32_0 = arith.constant 0 : i32
    %c0_i32_1 = arith.constant 0 : i32
    return %c0_i32, %c0_i32_0 : i32, i32
  }
  func.func @transform_7(%arg0: i32) -> (i32, i32) {
    %c0_i32 = arith.constant 0 : i32
    %c0_i32_0 = arith.constant 0 : i32
    %c0_i32_1 = arith.constant 0 : i32
    return %c0_i32, %c0_i32_0 : i32, i32
  }
  func.func @transform_8(%arg0: i32) -> (i32, i32, i32) {
    %c0_i32 = arith.constant 0 : i32
    %c0_i32_0 = arith.constant 0 : i32
    %c0_i32_1 = arith.constant 0 : i32
    %c0_i32_2 = arith.constant 0 : i32
    return %c0_i32, %c0_i32_0, %c0_i32_1 : i32, i32, i32
  }
}

</mosaic_0001>

<bundles_post_ra>
// kernel: tpu_custom_call.1
= control target key start
LH: loop header
LB: loop body
LE: loop exit
PB: predicated region body
PF: predicated region fallthrough
CT: control target
= control target key end

     0   :  { %vm41_vm0 = vcmask 261120   ;;  %s2301_s0 = inlined_call_operand.vmem [shape: f32[16,32], index: 0, kind: input, shape index: {}]   ;;  %s2302_s1 = inlined_call_operand.vmem [shape: f32[16,32], index: 1, kind: input, shape index: {}]   ;;  %s2303_s2 = inlined_call_operand.vmem [shape: f32[16,96], index: 2, kind: input, shape index: {}]   ;;  %s2304_s3 = inlined_call_operand.vmem [shape: f32[2,8], index: 3, kind: input, shape index: {}]   ;;  %s2305_s4 = inlined_call_operand.vmem [shape: f32[32,32], index: 4, kind: input, shape index: {}]   ;;  %s2306_s5 = inlined_call_operand.vmem [shape: f32[32,32], index: 5, kind: input, shape index: {}]   ;;  %s2307_s6 = inlined_call_operand.vmem [shape: f32[96,32], index: 6, kind: input, shape index: {}]   ;;  %s2308_s7 = inlined_call_operand.vmem [shape: f32[3,32], index: 7, kind: input, shape index: {}]   ;;  %s2309_s8 = inlined_call_operand.hbm [shape: f32[2,8,32], index: 8, kind: output, shape index: {}]  }
   0x1   :  { %v128_v0 = vld [vmem:[%s2306_s5 + $0x18] sm:$0xff]  ;;  %v127_v2 = vld [vmem:[%s2306_s5 + $0x10] sm:$0xff]  ;;  %v126_v4 = vld [vmem:[%s2306_s5 + $0x8] sm:$0xff] }
   0x2   :  { %v36_v1 = vld [vmem:[%s2305_s4 + $0x18] sm:$0xff]  ;;  %1826 = vmatprep.subr.mxu1 %v128_v0  ;;  %v35_v3 = vld [vmem:[%s2305_s4 + $0x10] sm:$0xff]  ;;  %v34_v5 = vld [vmem:[%s2305_s4 + $0x8] sm:$0xff] }
   0x3   :  { %1815 = vmatprep.subr.mxu0 %v36_v1  ;;  %1827 = vmatpush3.msra.mxu1 %v128_v0  ;;  %v125_v6 = vld [vmem:[%s2306_s5] sm:$0xff] }
   0x4   :  { %1816 = vmatpush3.msra.mxu0 %v36_v1  ;;  %1828 = vmatprep.subr.mxu1 %v127_v2  ;;  %v123_v7 = vld [vmem:[%s2302_s1] sm:$0xff] }
   0x5   :  { %1817 = vmatprep.subr.mxu0 %v35_v3  ;;  %1829 = vmatpush3.msra.mxu1 %v127_v2 }
   0x6   :  { %1818 = vmatpush3.msra.mxu0 %v35_v3 }
   0x7   :  { %13 = vsyncpa [#allocation3], 0  ;;  %1830 = vmatprep.subr.mxu1 %v126_v4  ;;  %1819 = vmatprep.subr.mxu0 %v34_v5  ;;  %v33_v8 = vld [vmem:[%s2305_s4] sm:$0xff]  ;;  %v124_v9 = vld [vmem:[%s2302_s1 + $0x8] sm:$0xff]  ;;  %v2009_v12 = vmov 0.0   ;;  %vm2010_vm1 = vmmov 0   ;;  %v37_v18 = vlaneseq }
   0x8   :  { %1831 = vmatpush3.msra.mxu1 %v126_v4  ;;  %1820 = vmatpush3.msra.mxu0 %v34_v5  ;;  %v31_v10 = vld [vmem:[%s2301_s0] sm:$0xff]  ;;  %v32_v11 = vld [vmem:[%s2301_s0 + $0x8] sm:$0xff]  ;;  %v227_v13 = vld [vmem:[%s2307_s6 + $0x58] sm:$0xff]  ;;  %vm232_vm2 = vcmask 785408   ;;  %vm368_vm3 = vcmask 64512   ;;  %s2011_s4 = smov 120  }
   0x9   :  { %1832 = vmatprep.subr.mxu1 %v125_v6  ;;  %1834 = vmatprep.mubr.msk.f32.mxu1 %vm41_vm0, %v123_v7  ;;  %v226_v14 = vld [vmem:[%s2307_s6 + $0x50] sm:$0xff]  ;;  %v225_v15 = vld [vmem:[%s2307_s6 + $0x48] sm:$0xff]  ;;  %v224_v16 = vld [vmem:[%s2307_s6 + $0x40] sm:$0xff]  ;;  %v2123_v19 = vshrl.u32 %v37_v18, 7  ;;  %v2014_v54 = vmov 1966171168  }
   0xa   :  { %1833 = vmatpush3.msra.mxu1 %v125_v6  ;;  %1821 = vmatprep.subr.mxu0 %v33_v8  ;;  %v223_v17 = vld [vmem:[%s2307_s6 + $0x38] sm:$0xff]  ;;  %v222_v20 = vld [vmem:[%s2307_s6 + $0x30] sm:$0xff]  ;;  %v221_v21 = vld [vmem:[%s2307_s6 + $0x28] sm:$0xff]  ;;  %v966_v55 = vunpack.c.l.s4 %v2014_v54  ;;  %s2016_s9 = smov 16   ;;  %s2017_s10 = smov 24   ;;  %vm1703_vm6 = vcmask 130048  }
   0xb   :  { %1835 = vmatmul.mubr.msk.f32.vlgmr.msra.gmra.mxu1 %vm41_vm0, %v124_v9  ;;  %1822 = vmatpush3.msra.mxu0 %v33_v8  ;;  %v131_v22 = vsub.s32 1, %v2123_v19  ;;  %v220_v23 = vld [vmem:[%s2307_s6 + $0x20] sm:$0xff]  ;;  %v2141_v25 = vsub.s32 0, %v2123_v19  ;;  %v219_v26 = vld [vmem:[%s2307_s6 + $0x18] sm:$0xff]  ;;  %v218_v28 = vld [vmem:[%s2307_s6 + $0x10] sm:$0xff]  ;;  %v230_v0 = vsub.s32 2, %v2123_v19 }
   0xc   :  { %1823 = vmatprep.mubr.msk.f32.mxu0 %vm41_vm0, %v31_v10  ;;  %1864 = vmatprep.subr.mxu1 %v2009_v12  ;;  %v2138_v24 = vld [vmem:[%s2308_s7] sm:$0x7]  ;;  %v217_v30 = vld [vmem:[%s2307_s6 + $0x8] sm:$0xff]  ;;  %v967_v58 = vunpack.c.0.s8 %v966_v55  ;;  %vm1706_vm7 = vcmask 195584   ;;  %s2018_s11 = smov [#allocation2]  }
   0xd   :  { %1824 = vmatmul.mubr.msk.f32.vlgmr.msra.gmra.mxu0 %vm41_vm0, %v32_v11  ;;  %1866 = vmatprep.mubr.msk.f32.mxu1 %vm2010_vm1, %v2009_v12  ;;  %v132_v27 = vrot.slane %v2138_v24, %v131_v22  ;;  %v40_v29 = vrot.slane %v2138_v24, %v2141_v25  ;;  %v216_v33 = vld [vmem:[%s2307_s6] sm:$0xff]  ;;  %v215_v39 = vld [vmem:[%s2303_s2 + $0x8] sm:$0xff]  ;;  %s2013_s6 = smov 104   ;;  %v231_v2 = vrot.slane %v2138_v24, %v230_v0  ;;  %s1716_s12 = sshll.u32 %s2018_s11, 4  ;;  %s1717_s12 = int_to_ptr.vmem [resolvable:$true] %s1716_s12 }
   0xe   :  { %1837 = vmatprep.subr.mxu0 %v227_v13  ;;  %v214_v34 = vld [vmem:[%s2303_s2] sm:$0xff]  ;;  %s2012_s2 = smov 112   ;;  %v970_v60 = vsub.s32 %v967_v58, %v2123_v19  ;;  %s1987_s13 = scalar_lea.vmem %s1717_s12, 256 }
   0xf   :  { %1838 = vmatpush3.msra.mxu0 %v227_v13  ;;  %1861 = vmatprep.mubr.msk.f32.mxu0 %vm232_vm2, %v214_v34  ;;  %v961_v56 = vld [vmem:[%s2304_s3] sm:$0x3]  ;;  %s2015_s3 = smov 8   ;;  %p1988_p0 = scmp.ne.s32.totalorder %s1717_s12, %s1987_s13 }
  0x10   :  { %1839 = vmatprep.subr.mxu0 %v226_v14  ;;  %v962_v57 = vsub.f32 1.0, %v961_v56  ;;  %p1992_p1 = scmp.lt.s32.totalorder %s1717_s12, %s1717_s12  ;;  %p1993_p2 = scmp.lt.s32.totalorder %s1987_s13, %s1987_s13 }
  0x11   :  { %1840 = vmatpush3.msra.mxu0 %v226_v14 }
  0x12   :  { %1841 = vmatprep.subr.mxu0 %v225_v15  ;;  %v963_v59 = vmul.f32 -1e+31, %v962_v57  ;;  %p1994_p3 = por %p1993_p2, %p1992_p1 }
  0x13   :  { %1842 = vmatpush3.msra.mxu0 %v225_v15 }
  0x14   :  { %1843 = vmatprep.subr.mxu0 %v224_v16  ;;  %v971_v61 = vrot.slane %v963_v59, %v970_v60  ;;  %p1995_p4 = pnand %p1994_p3, %p1988_p0 }
  0x15   :  { %1844 = vmatpush3.msra.mxu0 %v224_v16 }
  0x16   :  { %1845 = vmatprep.subr.mxu0 %v223_v17  ;;  %v972_v62 = vcombine.high %v971_v61, %v971_v61  ;;  %v979_v63 = vrot.slane %v971_v61, %v970_v60 }
  0x17   :  { %1846 = vmatpush3.msra.mxu0 %v223_v17 }
  0x18   :  { %1847 = vmatprep.subr.mxu0 %v222_v20  ;;  %v986_v1 = vrot.slane %v972_v62, %v970_v60  ;;  %v990_v4 = vrot.slane %v979_v63, %v2141_v25 }
  0x19   :  { %1848 = vmatpush3.msra.mxu0 %v222_v20 }
  0x1a   :  { %1849 = vmatprep.subr.mxu0 %v221_v21  ;;  %v994_v9 = vrot.slane %v986_v1, %v2141_v25 }
  0x1b   :  { %1850 = vmatpush3.msra.mxu0 %v221_v21 }
  0x1c   :  { %1851 = vmatprep.subr.mxu0 %v220_v23 }
  0x1d   :  { %1852 = vmatpush3.msra.mxu0 %v220_v23 }
  0x1e   :  { %1853 = vmatprep.subr.mxu0 %v219_v26 }
  0x1f   :  { %1854 = vmatpush3.msra.mxu0 %v219_v26 }
  0x20   :  { %1855 = vmatprep.subr.mxu0 %v218_v28 }
  0x21   :  { %1856 = vmatpush3.msra.mxu0 %v218_v28 }
  0x22   :  { %1857 = vmatprep.subr.mxu0 %v217_v30 }
  0x23   :  { %1858 = vmatpush3.msra.mxu0 %v217_v30 }
  0x24   :  { %1859 = vmatprep.subr.mxu0 %v216_v33 }
  0x25   :  { %1860 = vmatpush3.msra.mxu0 %v216_v33 }
  0x26   :  { %1862 = vmatmul.mubr.msk.f32.vlgmr.msra.gmra.mxu0 %vm232_vm2, %v215_v39  ;;  %1894 = vmatprep.subr.mxu0 %v2009_v12 }
  0x27   :  { %1896 = vmatprep.mubr.msk.f32.mxu0 %vm2010_vm1, %v2009_v12 }
  0xcb   :  { %v1836_v31 = vpop.f32.mrf.mxu1 }
  0xcc   :  { %v211_v32 = vadd.f32 %v1836_v31, %v132_v27 }
  0xcd   :  { %v1825_v35 = vpop.f32.mrf.mxu0  ;;  %v205_v36 = vpop.f32.mrf.mxu1 }
  0xce   :  { %v120_v37 = vadd.f32 %v1825_v35, %v40_v29  ;;  %v206_v38 = vadd.f32 %v205_v36, %v132_v27  ;;  %338 = vrot.lane.b32.xlu1 %v211_v32, %s2011_s4 }
  0xcf   :  { %v114_v40 = vpop.f32.mrf.mxu0 }
  0xd0   :  { %v115_v41 = vadd.f32 %v114_v40, %v40_v29  ;;  %336 = vrot.lane.b32.xlu0 %v206_v38, %s2011_s4  ;;  %1865 = vmatpush3.xpose.msk.msra.mxu1 %vm368_vm3, %v206_v38 }
  0xd1   :  { %1869 = vmatprep.subr.mxu1 %v2009_v12 }
  0xd2   :  { %324 = vrot.lane.b32.xlu1 %v120_v37, %s2011_s4 }
  0xd3   :  { %1867 = vmatmul.mubr.msk.f32.vlgmr.msra.gmra.mxu1 %vm368_vm3, %v115_v41 }
  0xd4   :  { %322 = vrot.lane.b32.xlu0 %v115_v41, %s2011_s4  ;;  %1870 = vmatpush3.xpose.msk.msra.mxu1 %vm368_vm3, %v211_v32 }
  0xd5   :  { %1871 = vmatprep.mubr.msk.f32.mxu1 %vm2010_vm1, %v2009_v12  ;;  %1874 = vmatprep.subr.mxu1 %v2009_v12 }
  0xd6   :  { %328 = vrot.lane.b32.xlu1 %v120_v37, %s2012_s2 }
  0xd7   :  { %1872 = vmatmul.mubr.msk.f32.vlgmr.msra.gmra.mxu1 %vm368_vm3, %v120_v37 }
  0xd8   :  { %340 = vrot.lane.b32.xlu0 %v206_v38, %s2012_s2  ;;  %1876 = vmatprep.mubr.msk.f32.mxu1 %vm2010_vm1, %v2009_v12 }
  0xda   :  { %326 = vrot.lane.b32.xlu1 %v115_v41, %s2012_s2 }
  0xdc   :  { %342 = vrot.lane.b32.xlu0 %v211_v32, %s2012_s2 }
  0xde   :  { %346 = vrot.lane.b32.xlu1 %v211_v32, %s2013_s6 }
  0xe0   :  { %344 = vrot.lane.b32.xlu0 %v206_v38, %s2013_s6 }
  0xe2   :  { %332 = vrot.lane.b32.xlu1 %v120_v37, %s2013_s6 }
  0xe4   :  { %330 = vrot.lane.b32.xlu0 %v115_v41, %s2013_s6 }
  0xe6   :  { %v1863_v3 = vpop.f32.mrf.mxu0 }
  0xe7   :  { %v311_v5 = vadd.f32 %v1863_v3, %v231_v2 }
  0xe8   :  { %v305_v6 = vpop.f32.mrf.mxu0 }
  0xe9   :  { %v306_v7 = vadd.f32 %v305_v6, %v231_v2  ;;  %v317_v10 = vmul.f32 0.01, %v311_v5  ;;  %vm315_vm4 = vcmp.gt.f32.partialorder %v311_v5, 0.0 }
  0xeb   :  { %vm314_vm5 = vcmp.gt.f32.partialorder %v306_v7, 0.0  ;;  %v316_v13 = vmul.f32 0.01, %v306_v7  ;;  %v2230_v18 = vsel %vm315_vm4, %v311_v5, %v317_v10 }
  0xed   :  { %v2228_v17 = vsel %vm314_vm5, %v306_v7, %v316_v13 }
 0x140   :  { %v339_v42 = vpop.permute.xlu1 %338 }
 0x142   :  { %v337_v43 = vpop.permute.xlu0 %336 }
 0x143   :  { %1875 = vmatpush3.xpose.msk.msra.mxu1 %vm368_vm3, %v337_v43 }
 0x144   :  { %v325_v44 = vpop.permute.xlu1 %324  ;;  %1879 = vmatprep.subr.mxu1 %v2009_v12 }
 0x146   :  { %v323_v45 = vpop.permute.xlu0 %322 }
 0x147   :  { %1877 = vmatmul.mubr.msk.f32.vlgmr.msra.gmra.mxu1 %vm368_vm3, %v323_v45 }
 0x148   :  { %1880 = vmatpush3.xpose.msk.msra.mxu1 %vm368_vm3, %v339_v42  ;;  %v329_v46 = vpop.permute.xlu1 %328  ;;  %1881 = vmatprep.mubr.msk.f32.mxu1 %vm2010_vm1, %v2009_v12 }
 0x149   :  { %1884 = vmatprep.subr.mxu1 %v2009_v12 }
 0x14a   :  { %v341_v47 = vpop.permute.xlu0 %340 }
 0x14b   :  { %1882 = vmatmul.mubr.msk.f32.vlgmr.msra.gmra.mxu1 %vm368_vm3, %v325_v44 }
 0x14c   :  { %1885 = vmatpush3.xpose.msk.msra.mxu1 %vm368_vm3, %v341_v47  ;;  %v327_v48 = vpop.permute.xlu1 %326  ;;  %1886 = vmatprep.mubr.msk.f32.mxu1 %vm2010_vm1, %v2009_v12 }
 0x14d   :  { %1889 = vmatprep.subr.mxu1 %v2009_v12 }
 0x14e   :  { %v343_v49 = vpop.permute.xlu0 %342 }
 0x14f   :  { %1887 = vmatmul.mubr.msk.f32.vlgmr.msra.gmra.mxu1 %vm368_vm3, %v327_v48 }
 0x150   :  { %1890 = vmatpush3.xpose.msk.msra.mxu1 %vm368_vm3, %v343_v49  ;;  %v347_v50 = vpop.permute.xlu1 %346  ;;  %1891 = vmatprep.mubr.msk.f32.mxu1 %vm2010_vm1, %v2009_v12 }
 0x151   :  { %1899 = vmatprep.subr.mxu1 %v2009_v12 }
 0x152   :  { %v345_v51 = vpop.permute.xlu0 %344 }
 0x153   :  { %1892 = vmatmul.mubr.msk.f32.vlgmr.msra.gmra.mxu1 %vm368_vm3, %v329_v46  ;;  %1895 = vmatpush3.xpose.msk.msra.mxu0 %vm368_vm3, %v345_v51 }
 0x154   :  { %1900 = vmatpush3.xpose.msk.msra.mxu1 %vm368_vm3, %v347_v50  ;;  %1901 = vmatprep.mubr.msk.f32.mxu1 %vm2010_vm1, %v2009_v12  ;;  %v333_v52 = vpop.permute.xlu1 %332 }
 0x155   :  { %1904 = vmatprep.subr.mxu0 %v2009_v12  ;;  %1909 = vmatprep.subr.mxu1 %v2009_v12 }
 0x156   :  { %v331_v53 = vpop.permute.xlu0 %330 }
 0x157   :  { %1897 = vmatmul.mubr.msk.f32.vlgmr.msra.gmra.mxu0 %vm368_vm3, %v331_v53  ;;  %1902 = vmatmul.mubr.msk.f32.vlgmr.msra.gmra.mxu1 %vm368_vm3, %v333_v52 }
 0x158   :  { %1911 = vmatprep.mubr.msk.f32.mxu1 %vm2010_vm1, %v2009_v12  ;;  %1906 = vmatprep.mubr.msk.f32.mxu0 %vm2010_vm1, %v2009_v12 }
 0x159   :  { %1905 = vmatpush3.msra.mxu0 %v2228_v17  ;;  %1910 = vmatpush3.msra.mxu1 %v2230_v18 }
 0x15a   :  { %1919 = vmatprep.subr.mxu1 %v2009_v12  ;;  %1914 = vmatprep.subr.mxu0 %v2009_v12 }
 0x193   :  { %v439_v8 = vpop.f32.mrf.mxu1 }
 0x194   :  { %v997_v11 = vadd.f32 %v990_v4, %v439_v8 }
 0x195   :  { %v1868_v14 = vpop.f32.mrf.mxu1 }
 0x196   :  { %v1005_v15 = vsel %vm368_vm3, %v997_v11, -inf }
 0x197   :  { %1006 = vmax.xlane.f32.xlu0 %v1005_v15  ;;  %v513_v16 = vpop.f32.mrf.mxu1 }
 0x198   :  { %v998_v19 = vadd.f32 %v994_v9, %v513_v16 }
 0x199   :  { %v1873_v20 = vpop.f32.mrf.mxu1 }
 0x19a   :  { %v1008_v21 = vsel %vm368_vm3, %v998_v19, -inf }
 0x19b   :  { %1009 = vmax.xlane.f32.xlu1 %v1008_v21 }
 0x207   :  { %v587_v22 = vpop.f32.mrf.mxu1 }
 0x208   :  { %v999_v23 = vadd.f32 %v990_v4, %v587_v22 }
 0x209   :  { %v1878_v24 = vpop.f32.mrf.mxu1 }
 0x20a   :  { %v1011_v25 = vsel %vm368_vm3, %v999_v23, -inf }
 0x20b   :  { %1012 = vmax.xlane.f32.xlu0 %v1011_v25  ;;  %v661_v26 = vpop.f32.mrf.mxu1 }
 0x20c   :  { %v1000_v27 = vadd.f32 %v994_v9, %v661_v26 }
 0x20d   :  { %v1883_v28 = vpop.f32.mrf.mxu1 }
 0x20e   :  { %v1014_v29 = vsel %vm368_vm3, %v1000_v27, -inf }
 0x20f   :  { %1015 = vmax.xlane.f32.xlu0 %v1014_v29  ;;  %v735_v30 = vpop.f32.mrf.mxu1 }
 0x210   :  { %v1001_v31 = vadd.f32 %v990_v4, %v735_v30 }
 0x211   :  { %v1888_v32 = vpop.f32.mrf.mxu1 }
 0x212   :  { %v1017_v33 = vsel %vm368_vm3, %v1001_v31, -inf }
 0x213   :  { %1018 = vmax.xlane.f32.xlu1 %v1017_v33  ;;  %v809_v34 = vpop.f32.mrf.mxu1 }
 0x214   :  { %v1002_v35 = vadd.f32 %v994_v9, %v809_v34 }
 0x215   :  { %v1893_v36 = vpop.f32.mrf.mxu1 }
 0x216   :  { %v1020_v37 = vsel %vm368_vm3, %v1002_v35, -inf }
 0x217   :  { %v883_v38 = vpop.f32.mrf.mxu0  ;;  %1021 = vmax.xlane.f32.xlu0 %v1020_v37  ;;  %v957_v39 = vpop.f32.mrf.mxu1 }
 0x218   :  { %v1003_v40 = vadd.f32 %v990_v4, %v883_v38  ;;  %v1004_v41 = vadd.f32 %v994_v9, %v957_v39 }
 0x219   :  { %v1898_v42 = vpop.f32.mrf.mxu0  ;;  %v1903_v43 = vpop.f32.mrf.mxu1 }
 0x21a   :  { %v1023_v44 = vsel %vm368_vm3, %v1003_v40, -inf  ;;  %v1026_v45 = vsel %vm368_vm3, %v1004_v41, -inf }
 0x21b   :  { %1024 = vmax.xlane.f32.xlu1 %v1023_v44  ;;  %1027 = vmax.xlane.f32.xlu0 %v1026_v45 }
 0x220   :  { %v1007_v49 = vpop.xlane.xlu0 %1006 }
 0x221   :  { %v1029_v50 = vsub.f32 %v997_v11, %v1007_v49 }
 0x223   :  { %v1037_v51 = vmul.f32 1.442695, %v1029_v50 }
 0x224   :  { %v1010_v46 = vpop.xlane.xlu1 %1009 }
 0x225   :  { %v1030_v47 = vsub.f32 %v998_v19, %v1010_v46 }
 0x227   :  { %v1039_v48 = vmul.f32 1.442695, %v1030_v47 }
 0x229   :  { %1955 = vpow2.f32 %v1039_v48 }
 0x22a   :  { %1957 = vpow2.f32 %v1037_v51 }
 0x22c   :  { %350 = vrot.lane.b32.xlu1 %v2228_v17, %s2011_s4 }
 0x230   :  { %356 = vrot.lane.b32.xlu1 %v2228_v17, %s2012_s2 }
 0x231   :  { %352 = vrot.lane.b32.xlu0 %v2230_v18, %s2011_s4 }
 0x234   :  { %358 = vrot.lane.b32.xlu1 %v2230_v18, %s2012_s2 }
 0x236   :  { %v1956_v52 = vpop.eup %1955 }
 0x237   :  { %v1056_v53 = vsel %vm368_vm3, %v1956_v52, 0.0  ;;  %v1958_v54 = vpop.eup %1957 }
 0x238   :  { %v1053_v55 = vsel %vm368_vm3, %v1958_v54, 0.0 }
 0x250   :  { %1057 = vadd.xlane.f32.xlu0 %v1056_v53 }
 0x258   :  { %1054 = vadd.xlane.f32.xlu1 %v1053_v55 }
 0x294   :  { %v1013_v56 = vpop.xlane.xlu0 %1012 }
 0x295   :  { %v1031_v57 = vsub.f32 %v999_v23, %v1013_v56 }
 0x297   :  { %v1041_v58 = vmul.f32 1.442695, %v1031_v57 }
 0x298   :  { %v1016_v59 = vpop.xlane.xlu0 %1015 }
 0x299   :  { %1959 = vpow2.f32 %v1041_v58  ;;  %v1032_v60 = vsub.f32 %v1000_v27, %v1016_v59 }
 0x29b   :  { %v1043_v61 = vmul.f32 1.442695, %v1032_v60 }
 0x29c   :  { %v1019_v62 = vpop.xlane.xlu1 %1018 }
 0x29d   :  { %1961 = vpow2.f32 %v1043_v61  ;;  %v1033_v1 = vsub.f32 %v1001_v31, %v1019_v62 }
 0x29f   :  { %v1045_v8 = vmul.f32 1.442695, %v1033_v1 }
 0x2a0   :  { %v1022_v63 = vpop.xlane.xlu0 %1021 }
 0x2a1   :  { %v1034_v0 = vsub.f32 %v1002_v35, %v1022_v63 }
 0x2a3   :  { %v1047_v2 = vmul.f32 1.442695, %v1034_v0 }
 0x2a4   :  { %v1025_v3 = vpop.xlane.xlu1 %1024  ;;  %v1028_v4 = vpop.xlane.xlu0 %1027 }
 0x2a5   :  { %1963 = vpow2.f32 %v1047_v2  ;;  %v1035_v5 = vsub.f32 %v1003_v40, %v1025_v3  ;;  %v1036_v6 = vsub.f32 %v1004_v41, %v1028_v4 }
 0x2a6   :  { %v1960_v7 = vpop.eup %1959 }
 0x2a7   :  { %v1049_v9 = vmul.f32 1.442695, %v1035_v5  ;;  %v1051_v10 = vmul.f32 1.442695, %v1036_v6  ;;  %v1059_v11 = vsel %vm368_vm3, %v1960_v7, 0.0 }
 0x2a8   :  { %1060 = vadd.xlane.f32.xlu1 %v1059_v11  ;;  %v351_v25 = vpop.permute.xlu1 %350  ;;  %v353_v26 = vpop.permute.xlu0 %352 }
 0x2a9   :  { %1965 = vpow2.f32 %v1049_v9 }
 0x2aa   :  { %v1962_v13 = vpop.eup %1961  ;;  %1967 = vpow2.f32 %v1051_v10 }
 0x2ab   :  { %1969 = vpow2.f32 %v1045_v8  ;;  %v1062_v14 = vsel %vm368_vm3, %v1962_v13, 0.0 }
 0x2ac   :  { %1063 = vadd.xlane.f32.xlu0 %v1062_v14  ;;  %v357_v27 = vpop.permute.xlu1 %356 }
 0x2b0   :  { %v359_v29 = vpop.permute.xlu1 %358 }
 0x2b2   :  { %v1964_v15 = vpop.eup %1963 }
 0x2b3   :  { %v1068_v16 = vsel %vm368_vm3, %v1964_v15, 0.0 }
 0x2b4   :  { %1069 = vadd.xlane.f32.xlu0 %v1068_v16 }
 0x2b6   :  { %v2256_v19 = vpop.eup %1965 }
 0x2b7   :  { %v1968_v20 = vpop.eup %1967  ;;  %v1071_v21 = vsel %vm368_vm3, %v2256_v19, 0.0 }
 0x2b8   :  { %v1970_v22 = vpop.eup %1969  ;;  %1072 = vadd.xlane.f32.xlu1 %v1071_v21  ;;  %v1074_v23 = vsel %vm368_vm3, %v1968_v20, 0.0 }
 0x2b9   :  { %1075 = vadd.xlane.f32.xlu0 %v1074_v23  ;;  %v1065_v24 = vsel %vm368_vm3, %v1970_v22, 0.0 }
 0x2bc   :  { %1066 = vadd.xlane.f32.xlu1 %v1065_v24 }
 0x2cd   :  { %364 = vrot.lane.b32.xlu1 %v2230_v18, %s2013_s6 }
 0x2cf   :  { %362 = vrot.lane.b32.xlu0 %v2228_v17, %s2013_s6 }
 0x2d9   :  { %v1058_v28 = vpop.xlane.xlu0 %1057 }
 0x2da   :  { %1971 = vrcp.f32 %v1058_v28 }
 0x2e1   :  { %v1055_v30 = vpop.xlane.xlu1 %1054 }
 0x2e2   :  { %1973 = vrcp.f32 %v1055_v30 }
 0x2e7   :  { %v1972_v31 = vpop.eup %1971 }
 0x2e8   :  { %v1086_v32 = vmul.f32 %v1972_v31, %v1956_v52 }
 0x2ea   :  { %1912 = vmatmul.mubr.msk.f32.vlgmr.msra.gmra.mxu1 %vm368_vm3, %v1086_v32 }
 0x2eb   :  { %1920 = vmatpush3.msra.mxu1 %v353_v26  ;;  %1921 = vmatprep.mubr.msk.f32.mxu1 %vm2010_vm1, %v2009_v12 }
 0x2ec   :  { %1929 = vmatprep.subr.mxu1 %v2009_v12 }
 0x2ef   :  { %v1974_v18 = vpop.eup %1973 }
 0x2f0   :  { %v1085_v17 = vmul.f32 %v1974_v18, %v1958_v54 }
 0x2f2   :  { %1907 = vmatmul.mubr.msk.f32.vlgmr.msra.gmra.mxu0 %vm368_vm3, %v1085_v17 }
 0x2f3   :  { %1915 = vmatpush3.msra.mxu0 %v351_v25  ;;  %1916 = vmatprep.mubr.msk.f32.mxu0 %vm2010_vm1, %v2009_v12 }
 0x2f4   :  { %1924 = vmatprep.subr.mxu0 %v2009_v12 }
 0x331   :  { %v1061_v33 = vpop.xlane.xlu1 %1060 }
 0x332   :  { %1975 = vrcp.f32 %v1061_v33 }
 0x335   :  { %v1064_v34 = vpop.xlane.xlu0 %1063 }
 0x336   :  { %1977 = vrcp.f32 %v1064_v34 }
 0x33d   :  { %v1070_v35 = vpop.xlane.xlu0 %1069 }
 0x33e   :  { %1979 = vrcp.f32 %v1070_v35 }
 0x33f   :  { %v1976_v36 = vpop.eup %1975 }
 0x340   :  { %v1087_v37 = vmul.f32 %v1976_v36, %v1960_v7 }
 0x341   :  { %v1073_v38 = vpop.xlane.xlu1 %1072 }
 0x342   :  { %v1076_v39 = vpop.xlane.xlu0 %1075  ;;  %1917 = vmatmul.mubr.msk.f32.vlgmr.msra.gmra.mxu0 %vm368_vm3, %v1087_v37 }
 0x343   :  { %v1978_v40 = vpop.eup %1977  ;;  %1981 = vrcp.f32 %v1076_v39  ;;  %1925 = vmatpush3.msra.mxu0 %v357_v27  ;;  %1926 = vmatprep.mubr.msk.f32.mxu0 %vm2010_vm1, %v2009_v12 }
 0x344   :  { %v1088_v41 = vmul.f32 %v1978_v40, %v1962_v13  ;;  %1934 = vmatprep.subr.mxu0 %v2009_v12 }
 0x345   :  { %v1067_v42 = vpop.xlane.xlu1 %1066 }
 0x346   :  { %1983 = vrcp.f32 %v1067_v42  ;;  %1922 = vmatmul.mubr.msk.f32.vlgmr.msra.gmra.mxu1 %vm368_vm3, %v1088_v41  ;;  %v363_v51 = vpop.permute.xlu0 %362 }
 0x347   :  { %1930 = vmatpush3.msra.mxu1 %v359_v29  ;;  %1931 = vmatprep.mubr.msk.f32.mxu1 %vm2010_vm1, %v2009_v12  ;;  %1985 = vrcp.f32 %v1073_v38 }
 0x348   :  { %1939 = vmatprep.subr.mxu1 %v2009_v12 }
 0x349   :  { %v365_v45 = vpop.permute.xlu1 %364 }
 0x34b   :  { %v1980_v43 = vpop.eup %1979 }
 0x34c   :  { %v1090_v44 = vmul.f32 %v1980_v43, %v1964_v15 }
 0x34e   :  { %1932 = vmatmul.mubr.msk.f32.vlgmr.msra.gmra.mxu1 %vm368_vm3, %v1090_v44 }
 0x34f   :  { %1940 = vmatpush3.msra.mxu1 %v365_v45  ;;  %1941 = vmatprep.mubr.msk.f32.mxu1 %vm2010_vm1, %v2009_v12 }
 0x350   :  { %v1982_v46 = vpop.eup %1981 }
 0x351   :  { %v1092_v47 = vmul.f32 %v1982_v46, %v1968_v20 }
 0x353   :  { %v1984_v48 = vpop.eup %1983  ;;  %1942 = vmatmul.mubr.msk.f32.vlgmr.msra.gmra.mxu1 %vm368_vm3, %v1092_v47 }
 0x354   :  { %v1089_v49 = vmul.f32 %v1984_v48, %v1970_v22  ;;  %v1986_v50 = vpop.eup %1985 }
 0x355   :  { %v1091_v52 = vmul.f32 %v1986_v50, %v2256_v19 }
 0x356   :  { %1927 = vmatmul.mubr.msk.f32.vlgmr.msra.gmra.mxu0 %vm368_vm3, %v1089_v49 }
 0x357   :  { %1935 = vmatpush3.msra.mxu0 %v363_v51  ;;  %1936 = vmatprep.mubr.msk.f32.mxu0 %vm2010_vm1, %v2009_v12 }
 0x35a   :  { %1937 = vmatmul.mubr.msk.f32.vlgmr.msra.gmra.mxu0 %vm368_vm3, %v1091_v52 }
 0x3aa   :  { %v1235_v53 = vpop.f32.mrf.mxu1 }
 0x3ac   :  { %v1913_v54 = vpop.f32.mrf.mxu1 }
 0x3b2   :  { %v1162_v55 = vpop.f32.mrf.mxu0 }
 0x3b4   :  { %v1908_v56 = vpop.f32.mrf.mxu0 }
 0x402   :  { %v1308_v57 = vpop.f32.mrf.mxu0 }
 0x403   :  { %1679 = vrot.lane.b32.xlu0 %v1308_v57, %s2015_s3 }
 0x404   :  { %v1918_v58 = vpop.f32.mrf.mxu0 }
 0x406   :  { %v1381_v59 = vpop.f32.mrf.mxu1 }
 0x407   :  { %1681 = vrot.lane.b32.xlu1 %v1381_v59, %s2015_s3 }
 0x408   :  { %v1923_v60 = vpop.f32.mrf.mxu1 }
 0x40e   :  { %v1527_v61 = vpop.f32.mrf.mxu1 }
 0x40f   :  { %1689 = vrot.lane.b32.xlu1 %v1527_v61, %s2016_s9 }
 0x410   :  { %v1933_v12 = vpop.f32.mrf.mxu1 }
 0x413   :  { %v1673_v62 = vpop.f32.mrf.mxu1 }
 0x414   :  { %1697 = vrot.lane.b32.xlu1 %v1673_v62, %s2017_s10 }
 0x415   :  { %v1943_v63 = vpop.f32.mrf.mxu1 }
 0x416   :  { %v1454_v0 = vpop.f32.mrf.mxu0 }
 0x417   :  { %1687 = vrot.lane.b32.xlu0 %v1454_v0, %s2016_s9 }
 0x418   :  { %v1928_v1 = vpop.f32.mrf.mxu0 }
 0x41a   :  { %v1600_v2 = vpop.f32.mrf.mxu0 }
 0x41b   :  { %1695 = vrot.lane.b32.xlu0 %v1600_v2, %s2017_s10 }
 0x41c   :  { %v1938_v3 = vpop.f32.mrf.mxu0 }
 0x475   :  { %v1680_v6 = vpop.permute.xlu0 %1679 }
 0x476   :  { %v1701_v13 = vsel %vm368_vm3, %v1162_v55, %v1680_v6 }
 0x479   :  { %v1682_v4 = vpop.permute.xlu1 %1681 }
 0x47a   :  { %v1702_v7 = vsel %vm368_vm3, %v1235_v53, %v1682_v4 }
 0x481   :  { %v1690_v5 = vpop.permute.xlu1 %1689 }
 0x482   :  { %v1705_v8 = vsel %vm1703_vm6, %v1702_v7, %v1690_v5 }
 0x486   :  { %v1698_v9 = vpop.permute.xlu1 %1697 }
 0x487   :  { %v1708_v10 = vsel %vm1706_vm7, %v1705_v8, %v1698_v9 }
 0x488   :  { %1710 = vst.msk [vmem:[#allocation2 + $0x8] sm:$0xff] %vm41_vm0, %v1708_v10 }
 0x489   :  { %v1688_v11 = vpop.permute.xlu0 %1687 }
 0x48a   :  { %v1704_v14 = vsel %vm1703_vm6, %v1701_v13, %v1688_v11 }
 0x48d   :  { %v1696_v15 = vpop.permute.xlu0 %1695 }
 0x48e   :  { %v1707_v16 = vsel %vm1706_vm7, %v1704_v14, %v1696_v15 }
 0x48f   :  { %1709 = vst.msk [vmem:[#allocation2] sm:$0xff] %vm41_vm0, %v1707_v16 }
 0x490   :  { %1998 = shalt.err (!%p1995_p4)
}
 0x491   :  { %s2019_s14 = smov 128  }
 0x492   :  { %1722 = dma.vmem_to_hbm [thread:$0]  %s1717_s12, 256, %s2309_s8, [#allocation3], %s2019_s14, %s2019_s14, %s2015_s3  }
 0x493   :  { %2007 = dma.done.wait [#allocation3], 256  }
 0x494   :  { %2008 = vsyncadd [#allocation3], 4294967040 }
 0x495   :  { %1726 = vsyncpa [#allocation3], 1 }

</bundles_post_ra>
